<compile_context>
chip_gen: v5e
topology: v5e:2x2
jax: 0.10.0
libtpu: 0.0.40
codegen_flags: <defaults>
</compile_context>

<pallas_src>
import functools
import math

import jax
import jax.numpy as jnp
from jax.experimental import pallas as pl
from jax.experimental.pallas import tpu as pltpu

EPS = 1e-5


def _round_up(x, m):
    return (x + m - 1) // m * m


def _vmem_budget_bytes():
    # Leave ~25% headroom for Mosaic internal scratch / double-buffering slack.
    # Fallback assumes the smallest per-TC VMEM across supported chips (v7x).
    try:
        cap = int(pltpu.get_tpu_info().vmem_capacity_bytes)
    except Exception:
        cap = 64 * 1024 * 1024
    return cap * 3 // 4


# ---------------------------------------------------------------------------
# Variant A: full-width weight resident in VMEM, 1-D grid over row tiles.
# W/b have constant block indices -> DMA'd from HBM once; LayerNorm + matmul
# live in one basic block so the VPU/EUP work hides under the MXU.
# ---------------------------------------------------------------------------
def _prenorm_full_kernel(x_ref, w_ref, b_ref, o_ref, *, inv_dim, eps):
    x = x_ref[...].astype(jnp.float32)
    # Stats over the REAL feature dim: zero-padded columns add 0 to both sums,
    # so E[x] and E[x^2] scaled by 1/dim are exact (biased var, like torch).
    s1 = jnp.sum(x, axis=-1, keepdims=True)
    s2 = jnp.sum(x * x, axis=-1, keepdims=True)
    mean = s1 * inv_dim
    var = jnp.maximum(s2 * inv_dim - mean * mean, 0.0)
    xn = ((x - mean) * jax.lax.rsqrt(var + eps)).astype(jnp.bfloat16)
    # Padded xn columns become -mean*rsqrt(...) != 0 but multiply exactly-zero
    # padded rows of W', so they contribute nothing.  INVARIANT: W rows past
    # the real `dim` must stay zero if the padding path is ever changed.
    out = jnp.dot(xn, w_ref[...], preferred_element_type=jnp.float32)
    o_ref[...] = (out + b_ref[...].astype(jnp.float32)).astype(o_ref.dtype)


# ---------------------------------------------------------------------------
# Variant B: N-tiled fallback for weights too large for VMEM residency.
# xn scratch caches the normalized rows across the (sequential) j axis.
# ---------------------------------------------------------------------------
def _prenorm_tiled_kernel(x_ref, w_ref, b_ref, o_ref, xn_ref, *, inv_dim, eps):
    # NOTE: the xn_ref reuse is only valid because j (grid axis 1) is the
    # innermost, sequentially executed ("arbitrary") axis and xn is recomputed
    # at j == 0 for every row tile i.  Do not reorder the grid or mark j
    # parallel while this scratch exists.
    j = pl.program_id(1)

    @pl.when(j == 0)
    def _():
        x = x_ref[...].astype(jnp.float32)
        s1 = jnp.sum(x, axis=-1, keepdims=True)
        s2 = jnp.sum(x * x, axis=-1, keepdims=True)
        mean = s1 * inv_dim
        var = jnp.maximum(s2 * inv_dim - mean * mean, 0.0)
        xn_ref[...] = ((x - mean) * jax.lax.rsqrt(var + eps)).astype(xn_ref.dtype)

    out = jnp.dot(xn_ref[...], w_ref[...], preferred_element_type=jnp.float32)
    o_ref[...] = (out + b_ref[...].astype(jnp.float32)).astype(o_ref.dtype)


def _choose_tile_m_full(n_rows, fits):
    """Pick a row-tile size (multiple of 16) minimizing padded rows."""
    if n_rows <= 128:
        tm = max(16, _round_up(n_rows, 16))
        return tm if fits(tm) else 16
    best = None
    for tm in (1024, 512, 256, 128):
        if not fits(tm):
            continue
        key = (_round_up(n_rows, tm), -tm)  # fewest padded rows, then biggest
        if best is None or key < best[0]:
            best = (key, tm)
    return best[1] if best is not None else 128


def _prenorm_apply(x, w_bf, b2d, *, dim, eps):
    """x: (..., dim) -> (..., dim) using the folded (padded, bf16) weight."""
    orig_shape = x.shape
    n_rows = math.prod(orig_shape[:-1])
    dim_p = w_bf.shape[0]
    x_isz = jnp.dtype(x.dtype).itemsize
    out_isz = x_isz
    budget = _vmem_budget_bytes()

    w_bytes = dim_p * dim_p * 2      # resident bf16 weight
    b_bytes = dim_p * 4

    def full_fits(tm):
        need = (2 * (tm * dim_p * x_isz + tm * dim_p * out_isz)
                + 2 * w_bytes + 2 * b_bytes)
        return int(1.25 * need) <= budget

    x2d = x.reshape(n_rows, dim)
    min_tm = max(16, min(128, _round_up(n_rows, 16)))
    use_full = full_fits(min_tm)

    if use_full:
        tile_m = _choose_tile_m_full(n_rows, full_fits)
        rows_p = _round_up(n_rows, tile_m)
        pad_r, pad_c = rows_p - n_rows, dim_p - dim
        if pad_r or pad_c:
            x2d = jnp.pad(x2d, ((0, pad_r), (0, pad_c)))

        need = (2 * (tile_m * dim_p * x_isz + tile_m * dim_p * out_isz)
                + 2 * w_bytes + 2 * b_bytes)
        vmem_limit = min(max(int(1.5 * need), 32 * 1024 * 1024), budget)

        kernel = functools.partial(_prenorm_full_kernel,
                                   inv_dim=1.0 / dim, eps=eps)
        out2d = pl.pallas_call(
            kernel,
            out_shape=jax.ShapeDtypeStruct((rows_p, dim_p), x.dtype),
            grid_spec=pltpu.PrefetchScalarGridSpec(
                num_scalar_prefetch=0,
                grid=(rows_p // tile_m,),
                in_specs=[
                    pl.BlockSpec((tile_m, dim_p), lambda i: (i, 0)),   # x rows
                    pl.BlockSpec((dim_p, dim_p), lambda i: (0, 0)),    # folded W
                    pl.BlockSpec((1, dim_p), lambda i: (0, 0)),        # folded b
                ],
                out_specs=pl.BlockSpec((tile_m, dim_p), lambda i: (i, 0)),
            ),
            compiler_params=pltpu.CompilerParams(
                dimension_semantics=("parallel",),        # shards across TCs on v7x
                vmem_limit_bytes=vmem_limit,
            ),
        )(x2d, w_bf, b2d)
    else:
        # Weight too large for VMEM residency: tile the output columns and
        # cache the normalized rows in a VMEM scratch across the j axis.
        def tiled_fits(tm, tn):
            need = (2 * (tm * dim_p * x_isz + dim_p * tn * 2 + tn * 4
                         + tm * tn * out_isz)
                    + tm * dim_p * 2)                      # xn scratch (bf16)
            return int(1.25 * need) <= budget

        tile_n, tile_m = None, None
        for tn in (512, 256, 128):                        # prefer 256-multiples
            if dim_p % tn:
                continue
            for tm in (256, 128, 64, 32, 16):
                if tiled_fits(tm, tn):
                    tile_n, tile_m = tn, tm
                    break
            if tile_n is not None:
                break
        if tile_n is None:
            tile_n, tile_m = 128, 16                       # last resort
        if n_rows <= tile_m:
            tile_m = max(16, _round_up(n_rows, 16))

        rows_p = _round_up(n_rows, tile_m)
        pad_r, pad_c = rows_p - n_rows, dim_p - dim
        if pad_r or pad_c:
            x2d = jnp.pad(x2d, ((0, pad_r), (0, pad_c)))

        need = (2 * (tile_m * dim_p * x_isz + dim_p * tile_n * 2 + tile_n * 4
                     + tile_m * tile_n * out_isz) + tile_m * dim_p * 2)
        vmem_limit = min(max(int(1.5 * need), 32 * 1024 * 1024), budget)

        kernel = functools.partial(_prenorm_tiled_kernel,
                                   inv_dim=1.0 / dim, eps=eps)
        out2d = pl.pallas_call(
            kernel,
            out_shape=jax.ShapeDtypeStruct((rows_p, dim_p), x.dtype),
            grid_spec=pltpu.PrefetchScalarGridSpec(
                num_scalar_prefetch=0,
                grid=(rows_p // tile_m, dim_p // tile_n),
                in_specs=[
                    pl.BlockSpec((tile_m, dim_p), lambda i, j: (i, 0)),
                    pl.BlockSpec((dim_p, tile_n), lambda i, j: (0, j)),
                    pl.BlockSpec((1, tile_n), lambda i, j: (0, j)),
                ],
                out_specs=pl.BlockSpec((tile_m, tile_n), lambda i, j: (i, j)),
                scratch_shapes=[pltpu.VMEM((tile_m, dim_p), jnp.bfloat16)],
            ),
            compiler_params=pltpu.CompilerParams(
                dimension_semantics=("parallel", "arbitrary"),
                vmem_limit_bytes=vmem_limit,
            ),
        )(x2d, w_bf, b2d)

    return out2d[:n_rows, :dim].reshape(orig_shape)


def make_prenorm_linear(gamma, beta, w, b, *, eps=EPS):
    """Build a PreNorm(dim, Linear(dim, dim)) apply fn.

    The LayerNorm-affine fold, feature padding and bf16 cast happen ONCE here
    (parameter-load time), not on every forward call.
    """
    dim = w.shape[0]
    wf32 = w.astype(jnp.float32)
    # Exact identity (fn is exactly Linear):
    #   (xn*gamma + beta) @ W + b == xn @ (gamma[:,None]*W) + (beta @ W + b)
    w_f = gamma.astype(jnp.float32)[:, None] * wf32
    b_f = beta.astype(jnp.float32) @ wf32 + b.astype(jnp.float32)

    dim_p = _round_up(dim, 128)
    if dim_p != dim:
        # Padded W rows/cols are EXACTLY zero -> padded xn columns cancel.
        w_f = jnp.pad(w_f, ((0, dim_p - dim), (0, dim_p - dim)))
        b_f = jnp.pad(b_f, (0, dim_p - dim))

    w_bf = w_f.astype(jnp.bfloat16)          # bf16 MXU operand
    b2d = b_f.reshape(1, dim_p)              # f32 bias, added post-accumulation

    def apply(x):
        return _prenorm_apply(x, w_bf, b2d, dim=dim, eps=eps)

    return apply


def reference(x, gamma, beta, w, b):
    xf = x.astype(jnp.float32)
    mean = jnp.mean(xf, axis=-1, keepdims=True)
    var = jnp.mean((xf - mean) ** 2, axis=-1, keepdims=True)
    xn = (xf - mean) / jnp.sqrt(var + EPS)
    y = xn * gamma + beta
    return (y @ w + b).astype(x.dtype)


if __name__ == "__main__":
    key = jax.random.PRNGKey(0)
    batch, seq, dim = 2, 8, 32
    k_x, k_g, k_b, k_w, k_bias = jax.random.split(key, 5)

    x = jax.random.normal(k_x, (batch, seq, dim), dtype=jnp.float32)
    # Deterministic parameter init (LayerNorm affine + Linear(dim, dim)).
    gamma = 1.0 + 0.1 * jax.random.normal(k_g, (dim,), dtype=jnp.float32)
    beta = 0.1 * jax.random.normal(k_b, (dim,), dtype=jnp.float32)
    w = jax.random.normal(k_w, (dim, dim), dtype=jnp.float32) / jnp.sqrt(dim)
    b = 0.1 * jax.random.normal(k_bias, (dim,), dtype=jnp.float32)

    prenorm = make_prenorm_linear(gamma, beta, w, b)
    out = jax.block_until_ready(prenorm(x))

    ref = reference(x, gamma, beta, w, b)
    assert out.shape == (batch, seq, dim)
    # bf16 MXU operands (f32 accumulate) -> slightly looser tolerance than f32.
    assert jnp.allclose(out, ref, atol=2e-2, rtol=2e-2), "mismatch vs reference"
    print("KERNEL_OK")
</pallas_src>

<mosaic_0001>
module attributes {stable_mosaic.version = 11 : i64} {
  func.func @_prenorm_full_kernel(%arg0: i32, %arg1: memref<16x128xf32, #tpu.memory_space<vmem>>, %arg2: memref<128x128xbf16, #tpu.memory_space<vmem>>, %arg3: memref<1x128xf32, #tpu.memory_space<vmem>>, %arg4: memref<16x128xf32, #tpu.memory_space<vmem>>) attributes {dimension_semantics = [#tpu.dimension_semantics<parallel>], iteration_bounds = array<i64: 1>, scalar_prefetch = 0 : i64, scratch_operands = 0 : i64, tpu.core_type = #tpu.core_type<tc>, window_params = [{transform_indices = @transform_0, window_bounds = array<i64: 16, 128>}, {pipeline_mode = #tpu.pipeline_mode<synchronous>, transform_indices = @transform_1, window_bounds = array<i64: 128, 128>}, {pipeline_mode = #tpu.pipeline_mode<synchronous>, transform_indices = @transform_2, window_bounds = array<i64: 1, 128>}, {transform_indices = @transform_3, window_bounds = array<i64: 16, 128>}]} {
    %c0 = arith.constant 0 : index
    %c0_0 = arith.constant 0 : index
    %0 = vector.load %arg1[%c0, %c0_0] : memref<16x128xf32, #tpu.memory_space<vmem>>, vector<16x128xf32>
    %cst = arith.constant dense<0.000000e+00> : vector<16xf32>
    %1 = vector.multi_reduction <add>, %0, %cst [1] : vector<16x128xf32> to vector<16xf32>
    %2 = vector.shape_cast %1 : vector<16xf32> to vector<16x1xf32>
    %3 = arith.mulf %0, %0 : vector<16x128xf32>
    %cst_1 = arith.constant dense<0.000000e+00> : vector<16xf32>
    %4 = vector.multi_reduction <add>, %3, %cst_1 [1] : vector<16x128xf32> to vector<16xf32>
    %5 = vector.shape_cast %4 : vector<16xf32> to vector<16x1xf32>
    %cst_2 = arith.constant 3.125000e-02 : f32
    %6 = vector.broadcast %cst_2 : f32 to vector<16x1xf32>
    %7 = arith.mulf %2, %6 : vector<16x1xf32>
    %cst_3 = arith.constant 3.125000e-02 : f32
    %8 = vector.broadcast %cst_3 : f32 to vector<16x1xf32>
    %9 = arith.mulf %5, %8 : vector<16x1xf32>
    %10 = arith.mulf %7, %7 : vector<16x1xf32>
    %11 = arith.subf %9, %10 : vector<16x1xf32>
    %cst_4 = arith.constant 0.000000e+00 : f32
    %12 = vector.broadcast %cst_4 : f32 to vector<16x1xf32>
    %13 = arith.maximumf %11, %12 : vector<16x1xf32>
    %14 = vector.broadcast %7 : vector<16x1xf32> to vector<16x128xf32>
    %15 = arith.subf %0, %14 : vector<16x128xf32>
    %cst_5 = arith.constant 9.99999974E-6 : f32
    %16 = vector.broadcast %cst_5 : f32 to vector<16x1xf32>
    %17 = arith.addf %13, %16 : vector<16x1xf32>
    %18 = math.rsqrt %17 : vector<16x1xf32>
    %19 = vector.broadcast %18 : vector<16x1xf32> to vector<16x128xf32>
    %20 = arith.mulf %15, %19 : vector<16x128xf32>
    %21 = arith.truncf %20 : vector<16x128xf32> to vector<16x128xbf16>
    %c0_6 = arith.constant 0 : index
    %c0_7 = arith.constant 0 : index
    %22 = vector.load %arg2[%c0_6, %c0_7] : memref<128x128xbf16, #tpu.memory_space<vmem>>, vector<128x128xbf16>
    %cst_8 = arith.constant dense<0.000000e+00> : vector<16x128xf32>
    %23 = tpu.matmul %21, %22, %cst_8 {dimension_numbers = #tpu.dot_dimension_numbers<[1], [0], [0], [1], [0, 0, 1, 1], [], []>} : vector<16x128xbf16>, vector<128x128xbf16>, vector<16x128xf32> -> vector<16x128xf32>
    %c0_9 = arith.constant 0 : index
    %c0_10 = arith.constant 0 : index
    %24 = vector.load %arg3[%c0_9, %c0_10] : memref<1x128xf32, #tpu.memory_space<vmem>>, vector<1x128xf32>
    %25 = vector.broadcast %24 : vector<1x128xf32> to vector<16x128xf32>
    %26 = arith.addf %23, %25 : vector<16x128xf32>
    %c0_11 = arith.constant 0 : index
    %c0_12 = arith.constant 0 : index
    %27 = vector.load %arg4[%c0_11, %c0_12] : memref<16x128xf32, #tpu.memory_space<vmem>>, vector<16x128xf32>
    tpu.vector_store %arg4[%c0_11, %c0_12], %26 {strides = array<i32>} : memref<16x128xf32, #tpu.memory_space<vmem>>, vector<16x128xf32>,
    return
  }
  func.func @transform_0(%arg0: i32) -> (i32, i32) {
    %c0_i32 = arith.constant 0 : i32
    %c0_i32_0 = arith.constant 0 : i32
    return %arg0, %c0_i32 : i32, i32
  }
  func.func @transform_1(%arg0: i32) -> (i32, i32) {
    %c0_i32 = arith.constant 0 : i32
    %c0_i32_0 = arith.constant 0 : i32
    %c0_i32_1 = arith.constant 0 : i32
    return %c0_i32, %c0_i32_0 : i32, i32
  }
  func.func @transform_2(%arg0: i32) -> (i32, i32) {
    %c0_i32 = arith.constant 0 : i32
    %c0_i32_0 = arith.constant 0 : i32
    %c0_i32_1 = arith.constant 0 : i32
    return %c0_i32, %c0_i32_0 : i32, i32
  }
  func.func @transform_3(%arg0: i32) -> (i32, i32) {
    %c0_i32 = arith.constant 0 : i32
    %c0_i32_0 = arith.constant 0 : i32
    return %arg0, %c0_i32 : i32, i32
  }
}

</mosaic_0001>

<bundles_post_ra>
// kernel: tpu_custom_call.1
= control target key start
LH: loop header
LB: loop body
LE: loop exit
PB: predicated region body
PF: predicated region fallthrough
CT: control target
= control target key end

     0   :  { %8 = vsyncpa [#allocation3], 0  ;;  %s381_s0 = inlined_call_operand.hbm [shape: f32[16,128], index: 0, kind: input, shape index: {}]   ;;  %s382_s1 = inlined_call_operand.hbm [shape: bf16[128,128], index: 1, kind: input, shape index: {}]   ;;  %s383_s2 = inlined_call_operand.vmem [shape: f32[1,128], index: 2, kind: input, shape index: {}]   ;;  %s384_s3 = inlined_call_operand.hbm [shape: f32[16,128], index: 3, kind: output, shape index: {}]  }
   0x1   :  { %9 = vsyncpa [#allocation6], 0 }
   0x2   :  { %10 = vsyncpa [#allocation4], 0  ;;  %s15_s14 = sshll.u32 %s381_s0, 4  ;;  %s330_s15 = smov [#allocation2]   ;;  %s16_s14 = int_to_ptr.hbm [resolvable:$true] %s15_s14 }
   0x3   :  { %s17_s16 = sshll.u32 %s330_s15, 4  ;;  %s28_s19 = sshll.u32 %s382_s1, 4  ;;  %s18_s16 = int_to_ptr.vmem [resolvable:$true] %s17_s16  ;;  %s29_s19 = int_to_ptr.hbm [resolvable:$true] %s28_s19 }
   0x4   :  { %s331_s20 = smov 128   ;;  %s332_s21 = smov 8  }
   0x5   :  { %23 = dma.hbm_to_vmem [thread:$0]  %s16_s14, 256, %s18_s16, [#allocation3], %s331_s20, %s331_s20, %s332_s21  }
   0x6   :  { %s333_s22 = smov [#allocation5]   ;;  %s334_s24 = smov 64  }
   0x7   :  { %s30_s23 = sshll.u32 %s333_s22, 4  ;;  %s335_s0 = smov 4   ;;  %s31_s23 = int_to_ptr.vmem [resolvable:$true] %s30_s23 }
   0x8   :  { %36 = dma.hbm_to_vmem [thread:$0]  %s29_s19, 1024, %s31_s23, [#allocation6], %s334_s24, %s334_s24, %s335_s0  }
   0x9   :  { %324 = dma.done.wait [#allocation3], 256  }
   0xa   :  { %325 = vsyncadd [#allocation3], 4294967040 }
   0xb   :  { %326 = dma.done.wait [#allocation6], 1024  }
   0xc   :  { %327 = vsyncadd [#allocation6], 4294966272  ;;  %v366_v0 = vld [vmem:[#allocation2] sm:$0xff]  ;;  %v48_v2 = vld [vmem:[#allocation2 + $0x8] sm:$0xff]  ;;  %s336_s26 = smov [#allocation7]   ;;  %s186_s30 = sshll.u32 %s384_s3, 4  ;;  %s187_s30 = int_to_ptr.hbm [resolvable:$true] %s186_s30 }
   0xd   :  { %49 = vadd.xlane.f32.xlu0 %v366_v0  ;;  %v53_v1 = vmul.f32 %v366_v0, %v366_v0  ;;  %v54_v3 = vmul.f32 %v48_v2, %v48_v2  ;;  %v239_v4 = vld [vmem:[#allocation5 + $0x38] sm:$0xff]  ;;  %v238_v5 = vld [vmem:[#allocation5 + $0x30] sm:$0xff]  ;;  %v237_v6 = vld [vmem:[#allocation5 + $0x28] sm:$0xff]  ;;  %s184_s27 = sshll.u32 %s336_s26, 4  ;;  %s185_s27 = int_to_ptr.vmem [resolvable:$true] %s184_s27 }
   0xe   :  { %164 = vmatpush.bf16.msra.mxu0 %v239_v4  ;;  %v236_v7 = vld [vmem:[#allocation5 + $0x20] sm:$0xff]  ;;  %v235_v8 = vld [vmem:[#allocation5 + $0x18] sm:$0xff]  ;;  %v234_v9 = vld [vmem:[#allocation5 + $0x10] sm:$0xff] }
   0xf   :  { %55 = vadd.xlane.f32.xlu1 %v53_v1  ;;  %v233_v11 = vld [vmem:[#allocation5 + $0x8] sm:$0xff]  ;;  %v232_v14 = vld [vmem:[#allocation5] sm:$0xff]  ;;  %v247_v47 = vld [vmem:[%s383_s2] ss:$0 sm:$0xff] }
  0x12   :  { %165 = vmatpush.bf16.msra.mxu0 %v238_v5 }
  0x15   :  { %51 = vadd.xlane.f32.xlu0 %v48_v2 }
  0x16   :  { %166 = vmatpush.bf16.msra.mxu0 %v237_v6 }
  0x17   :  { %57 = vadd.xlane.f32.xlu1 %v54_v3 }
  0x1a   :  { %167 = vmatpush.bf16.msra.mxu0 %v236_v7 }
  0x1e   :  { %168 = vmatpush.bf16.msra.mxu0 %v235_v8 }
  0x22   :  { %169 = vmatpush.bf16.msra.mxu0 %v234_v9 }
  0x26   :  { %170 = vmatpush.bf16.msra.mxu0 %v233_v11 }
  0x2a   :  { %171 = vmatpush.bf16.msra.mxu0 %v232_v14 }
  0x80   :  { %v50_v10 = vpop.xlane.xlu0 %49 }
  0x81   :  { %v59_v12 = vmul.f32 0.03125, %v50_v10 }
  0x82   :  { %v56_v13 = vpop.xlane.xlu1 %55 }
  0x83   :  { %v63_v15 = vmul.f32 %v59_v12, %v59_v12  ;;  %v61_v16 = vmul.f32 0.03125, %v56_v13  ;;  %v69_v41 = vsub.f32 %v366_v0, %v59_v12 }
  0x85   :  { %v65_v17 = vsub.f32 %v61_v16, %v63_v15 }
  0x87   :  { %v67_v18 = vmax.f32 %v65_v17, 0.0 }
  0x88   :  { %v52_v19 = vpop.xlane.xlu0 %51 }
  0x89   :  { %v71_v20 = vadd.f32 1e-05, %v67_v18  ;;  %v60_v21 = vmul.f32 0.03125, %v52_v19 }
  0x8a   :  { %v58_v22 = vpop.xlane.xlu1 %57 }
  0x8b   :  { %248 = vrsqrt.f32 %v71_v20  ;;  %v64_v23 = vmul.f32 %v60_v21, %v60_v21  ;;  %v62_v24 = vmul.f32 0.03125, %v58_v22  ;;  %vm79_vm1 = vweird.f32 %v71_v20 }
  0x8c   :  { %v70_v42 = vsub.f32 %v48_v2, %v60_v21 }
  0x8d   :  { %v66_v25 = vsub.f32 %v62_v24, %v64_v23 }
  0x8f   :  { %v68_v26 = vmax.f32 %v66_v25, 0.0 }
  0x91   :  { %v249_v27 = vpop.eup %248  ;;  %v72_v28 = vadd.f32 1e-05, %v68_v26 }
  0x92   :  { %v74_v29 = vmul.f32 %v249_v27, %v71_v20  ;;  %vm80_vm0 = vweird.f32 %v249_v27 }
  0x93   :  { %250 = vrsqrt.f32 %v72_v28  ;;  %vm81_vm3 = vmor %vm79_vm1, %vm80_vm0  ;;  %vm89_vm4 = vweird.f32 %v72_v28 }
  0x94   :  { %v75_v30 = vmul.f32 %v249_v27, %v74_v29 }
  0x96   :  { %v76_v31 = vmul.f32 0.5, %v75_v30 }
  0x98   :  { %v77_v34 = vsub.f32 1.5, %v76_v31 }
  0x99   :  { %v251_v32 = vpop.eup %250 }
  0x9a   :  { %v84_v33 = vmul.f32 %v251_v32, %v72_v28  ;;  %v78_v37 = vmul.f32 %v249_v27, %v77_v34  ;;  %vm90_vm2 = vweird.f32 %v251_v32 }
  0x9b   :  { %vm91_vm5 = vmor %vm89_vm4, %vm90_vm2 }
  0x9c   :  { %v85_v35 = vmul.f32 %v251_v32, %v84_v33  ;;  %v82_v39 = vsel %vm81_vm3, %v249_v27, %v78_v37 }
  0x9d   :  { %v93_v44 = vmul.f32 %v82_v39, %v69_v41 }
  0x9e   :  { %v86_v36 = vmul.f32 0.5, %v85_v35 }
  0xa0   :  { %v87_v38 = vsub.f32 1.5, %v86_v36 }
  0xa2   :  { %v88_v40 = vmul.f32 %v251_v32, %v87_v38 }
  0xa4   :  { %v92_v43 = vsel %vm91_vm5, %v251_v32, %v88_v40 }
  0xa5   :  { %v94_v45 = vmul.f32 %v92_v43, %v70_v42 }
  0xa7   :  { %v95_v46 = vpack.c.bf16 %v94_v45, %v93_v44 }
  0xa9   :  { %172 = vmatmul.bf16.vlgmr.msra.gmra.mxu0 %v95_v46 }
 0x126   :  { %v173_v48 = vpop.f32.mrf.mxu0 }
 0x127   :  { %v174_v49 = vadd.f32 %v247_v47, %v173_v48 }
 0x129   :  { %178 = vst [vmem:[#allocation7] sm:$0xff] %v174_v49 }
 0x12e   :  { %v175_v50 = vpop.f32.mrf.mxu0 }
 0x12f   :  { %v176_v51 = vadd.f32 %v247_v47, %v175_v50 }
 0x131   :  { %179 = vst [vmem:[#allocation7 + $0x8] sm:$0xff] %v176_v51 }
 0x132   :  { %192 = dma.vmem_to_hbm [thread:$0]  %s185_s27, 256, %s187_s30, [#allocation4], %s331_s20, %s331_s20, %s332_s21  }
 0x133   :  { %328 = dma.done.wait [#allocation4], 256  }
 0x134   :  { %329 = vsyncadd [#allocation4], 4294967040 }
 0x135   :  { %197 = vsyncpa [#allocation3], 1 }
 0x136   :  { %198 = vsyncpa [#allocation6], 1 }
 0x137   :  { %199 = vsyncpa [#allocation4], 1 }

</bundles_post_ra>
